<compile_context>
chip_gen: v7x
topology: tpu7x:2x2x1
jax: 0.10.0
libtpu: 0.0.40
codegen_flags: <defaults>
</compile_context>

<pallas_src>
import functools

import jax
import jax.numpy as jnp
from jax import lax
from jax.experimental import pallas as pl
from jax.experimental.pallas import tpu as pltpu


# ----------------------------- Pallas kernel ------------------------------

def _audio_model_kernel(len_ref, x_ref, wih_ref, whh_ref, blstm_ref,
                        w1_ref, b1_ref, w2_ref, b2_ref,
                        out_ref,
                        zx_ref, h_ref, c_ref,
                        *, t_blk, b_blk, hidden_size):
    """One grid point = (batch block, time block).

    len_ref  : (B_blk, 1)  int32        valid sequence lengths
    x_ref    : (T_blk, B_blk, D_in) bf16  time-major input block
    wih_ref  : (D_in, 4H) bf16          LSTM input weights^T (gate order i,f,g,o)
    whh_ref  : (H, 4H)    bf16          LSTM recurrent weights^T
    blstm_ref: (1, 4H)    f32           b_ih + b_hh
    w1_ref   : (H, OUTp)  bf16          linear_1 W^T (lane-padded)
    b1_ref   : (1, OUTp)  f32
    w2_ref   : (OUTp, POSTp) bf16       post_audio_layer_1 W^T (padded)
    b2_ref   : (1, POSTp) f32
    out_ref  : (B_blk, POSTp) f32       written only at the last time block
    zx_ref   : (T_blk*B_blk, 4H) f32    scratch: block input projection
    h_ref/c_ref : (B_blk, H) f32        scratch: LSTM state carried across time blocks
    """
    H = hidden_size
    ti = pl.program_id(1)
    n_t = pl.num_programs(1)

    # ---- init carried state at the first time block of each batch block ----
    @pl.when(ti == 0)
    def _():
        h_ref[...] = jnp.zeros_like(h_ref)
        c_ref[...] = jnp.zeros_like(c_ref)

    # ---- hoisted input projection for this time block: ONE MXU dot ----
    x_blk = x_ref[...].reshape(t_blk * b_blk, -1)                    # bf16, free reshape
    zx_ref[...] = (jnp.dot(x_blk, wih_ref[...],
                           preferred_element_type=jnp.float32)
                   + blstm_ref[...])                                 # (T_blk*B_blk, 4H) f32

    whh = whh_ref[...]                                               # (H, 4H) bf16
    # hoisted mask operand: lengths broadcast once per block
    lens_bh = jnp.broadcast_to(len_ref[...], (b_blk, H))             # int32
    t_base = ti * t_blk

    h0 = h_ref[...]
    c0 = c_ref[...]

    def step(t, carry):
        h, c = carry
        row0 = pl.multiple_of(t * b_blk, 8)
        z = zx_ref[pl.ds(row0, b_blk), :] + jnp.dot(
            h.astype(whh.dtype), whh, preferred_element_type=jnp.float32)  # (B_blk, 4H)

        if H >= 128:
            # lane-dense per-gate EUP calls: 5 gate-widths of EUP work per step.
            i_g = jax.nn.sigmoid(z[:, 0 * H:1 * H])
            f_g = jax.nn.sigmoid(z[:, 1 * H:2 * H])
            g_g = jnp.tanh(z[:, 2 * H:3 * H])
            o_g = jax.nn.sigmoid(z[:, 3 * H:4 * H])
        else:
            # 4H <= 128: full-vreg EUP passes cost the same number of vregs.
            sig_z = jax.nn.sigmoid(z)
            tanh_z = jnp.tanh(z)
            i_g = sig_z[:, 0 * H:1 * H]
            f_g = sig_z[:, 1 * H:2 * H]
            g_g = tanh_z[:, 2 * H:3 * H]
            o_g = sig_z[:, 3 * H:4 * H]

        c_new = f_g * c + i_g * g_g
        h_new = o_g * jnp.tanh(c_new)

        # pack_padded_sequence semantics: freeze state once t >= length[b]
        valid = lens_bh > (t_base + t)                               # (B_blk, H) bool
        return jnp.where(valid, h_new, h), jnp.where(valid, c_new, c)

    # short, static trip count -> fully unrolled but with bounded liveness
    h, c = lax.fori_loop(0, t_blk, step, (h0, c0), unroll=True)

    # carry state to the next time block
    h_ref[...] = h
    c_ref[...] = c

    # ---- final linears + ReLU only after the last time block ----
    # dropout layers are identity in eval mode.
    @pl.when(ti == n_t - 1)
    def _():
        y1 = jnp.dot(h.astype(w1_ref.dtype), w1_ref[...],
                     preferred_element_type=jnp.float32) + b1_ref[...]   # (B_blk, OUTp)
        y2 = jnp.dot(y1.astype(w2_ref.dtype), w2_ref[...],
                     preferred_element_type=jnp.float32) + b2_ref[...]   # (B_blk, POSTp)
        out_ref[...] = jnp.maximum(y2, 0.0)                              # ReLU


# ------------------------------ wrapper -----------------------------------

def _round_up(n, m):
    return ((n + m - 1) // m) * m


def audio_model_forward(audio, audio_lengths, params, *, t_blk=None, b_blk=None):
    """audio: (B, T, D_in) f32, audio_lengths: (B,) int32."""
    B, T, D_in = audio.shape
    H = params["whh_t"].shape[0]
    OUT = params["w1_t"].shape[1]
    POST = params["w2_t"].shape[1]

    LANE, SUB = 128, 8

    # batch blocking: up to 128 rows per block (fills MXU rows); blocks are a
    # 'parallel' grid axis so they shard across TensorCores on v7x.
    if b_blk is None:
        b_blk = min(_round_up(B, SUB), 128)
    B_pad = _round_up(B, b_blk)

    # time blocking: stream x through VMEM instead of holding (T, B, D) whole.
    if t_blk is None:
        t_blk = T if T <= 16 else 16
    T_pad = _round_up(T, t_blk)

    OUT_pad = _round_up(OUT, LANE)
    POST_pad = _round_up(POST, LANE)
    bf16 = jnp.bfloat16

    # time-major x; padded batch rows (length 0) and padded time steps are
    # frozen out by the length mask in the kernel.
    x = jnp.transpose(audio.astype(jnp.float32), (1, 0, 2))          # (T, B, D_in)
    x = jnp.pad(x, ((0, T_pad - T), (0, B_pad - B), (0, 0))).astype(bf16)

    lens2d = jnp.pad(audio_lengths.astype(jnp.int32),
                     (0, B_pad - B)).reshape(B_pad, 1)

    wih = params["wih_t"].astype(bf16)
    whh = params["whh_t"].astype(bf16)
    b_lstm = params["b_lstm"].astype(jnp.float32)

    # lane-pad linear layers with zeros so the final store is lane-dense
    w1 = jnp.pad(params["w1_t"], ((0, 0), (0, OUT_pad - OUT))).astype(bf16)
    b1 = jnp.pad(params["b1"], ((0, 0), (0, OUT_pad - OUT))).astype(jnp.float32)
    w2 = jnp.pad(params["w2_t"], ((0, OUT_pad - OUT),
                                  (0, POST_pad - POST))).astype(bf16)
    b2 = jnp.pad(params["b2"], ((0, 0), (0, POST_pad - POST))).astype(jnp.float32)

    n_b = B_pad // b_blk
    n_t = T_pad // t_blk

    def const(shape):
        return pl.BlockSpec(shape, lambda bi, ti, _s=len(shape): (0,) * _s)

    kernel = functools.partial(_audio_model_kernel,
                               t_blk=t_blk, b_blk=b_blk, hidden_size=H)

    out = pl.pallas_call(
        kernel,
        out_shape=jax.ShapeDtypeStruct((B_pad, POST_pad), jnp.float32),
        grid_spec=pltpu.PrefetchScalarGridSpec(
            num_scalar_prefetch=0,
            grid=(n_b, n_t),                       # (batch blocks, time blocks)
            in_specs=[
                pl.BlockSpec((b_blk, 1), lambda bi, ti: (bi, 0)),             # lengths
                pl.BlockSpec((t_blk, b_blk, D_in), lambda bi, ti: (ti, bi, 0)),  # x block
                const((D_in, 4 * H)),              # W_ih^T
                const((H, 4 * H)),                 # W_hh^T
                const((1, 4 * H)),                 # b_ih + b_hh
                const((H, OUT_pad)),               # linear_1 W^T (padded)
                const((1, OUT_pad)),               # linear_1 b   (padded)
                const((OUT_pad, POST_pad)),        # post_audio_layer_1 W^T (padded)
                const((1, POST_pad)),              # post_audio_layer_1 b   (padded)
            ],
            out_specs=pl.BlockSpec((b_blk, POST_pad), lambda bi, ti: (bi, 0)),
            scratch_shapes=[
                pltpu.VMEM((t_blk * b_blk, 4 * H), jnp.float32),   # zx block
                pltpu.VMEM((b_blk, H), jnp.float32),               # h carry
                pltpu.VMEM((b_blk, H), jnp.float32),               # c carry
            ]),
        compiler_params=pltpu.CompilerParams(
            dimension_semantics=("parallel", "arbitrary"),
            vmem_limit_bytes=32 * 1024 * 1024),
    )(lens2d, x, wih, whh, b_lstm, w1, b1, w2, b2)

    return out[:B, :POST]


# ------------------------- pure-JAX reference -----------------------------

def _reference_forward(audio, lengths, params):
    """Mirrors kernel math: bf16 matmul operands, f32 accumulation / state."""
    B, T, D_in = audio.shape
    H = params["whh_t"].shape[0]
    bf16 = jnp.bfloat16

    x = audio.astype(bf16)
    wih = params["wih_t"].astype(bf16)
    whh = params["whh_t"].astype(bf16)

    h = jnp.zeros((B, H), jnp.float32)
    c = jnp.zeros((B, H), jnp.float32)
    for t in range(T):
        zx = jnp.dot(x[:, t, :], wih,
                     preferred_element_type=jnp.float32) + params["b_lstm"][0]
        z = zx + jnp.dot(h.astype(bf16), whh, preferred_element_type=jnp.float32)
        i = jax.nn.sigmoid(z[:, 0 * H:1 * H])
        f = jax.nn.sigmoid(z[:, 1 * H:2 * H])
        g = jnp.tanh(z[:, 2 * H:3 * H])
        o = jax.nn.sigmoid(z[:, 3 * H:4 * H])
        cn = f * c + i * g
        hn = o * jnp.tanh(cn)
        m = (t < lengths)[:, None]
        h = jnp.where(m, hn, h)
        c = jnp.where(m, cn, c)
    y1 = jnp.dot(h.astype(bf16), params["w1_t"].astype(bf16),
                 preferred_element_type=jnp.float32) + params["b1"][0]
    y2 = jnp.dot(y1.astype(bf16), params["w2_t"].astype(bf16),
                 preferred_element_type=jnp.float32) + params["b2"][0]
    return jnp.maximum(y2, 0.0)


# --------------------------------- main ------------------------------------

if __name__ == "__main__":
    # Small config implied by the module:
    #   audio_in=16, a_lstm_hidden_size=32, a_lstm_layers=1,
    #   audio_out=16, post_audio_dim=32, batch=2, seq_len=8.
    B, T = 2, 8
    AUDIO_IN, HIDDEN, AUDIO_OUT, POST_DIM = 16, 32, 16, 32

    key = jax.random.PRNGKey(0)
    keys = jax.random.split(key, 10)

    params = {
        # LSTM weights, gate order (i, f, g, o), stored transposed.
        "wih_t": 0.1 * jax.random.normal(keys[0], (AUDIO_IN, 4 * HIDDEN), jnp.float32),
        "whh_t": 0.1 * jax.random.normal(keys[1], (HIDDEN, 4 * HIDDEN), jnp.float32),
        "b_lstm": 0.1 * jax.random.normal(keys[2], (1, 4 * HIDDEN), jnp.float32),  # b_ih + b_hh
        # AuViSubNet.linear_1
        "w1_t": 0.1 * jax.random.normal(keys[3], (HIDDEN, AUDIO_OUT), jnp.float32),
        "b1": 0.1 * jax.random.normal(keys[4], (1, AUDIO_OUT), jnp.float32),
        # post_audio_layer_1
        "w2_t": 0.1 * jax.random.normal(keys[5], (AUDIO_OUT, POST_DIM), jnp.float32),
        "b2": 0.1 * jax.random.normal(keys[6], (1, POST_DIM), jnp.float32),
    }
    # TODO(synk): dropout layers (a_lstm_dropout, post_audio_dropout) are identity in eval mode.

    audio = jax.random.normal(keys[7], (B, T, AUDIO_IN), jnp.float32)
    audio_lengths = jnp.array([T, 5], dtype=jnp.int32)

    out = audio_model_forward(audio, audio_lengths, params)
    out = jax.block_until_ready(out)

    ref = _reference_forward(audio, audio_lengths, params)
    assert out.shape == (B, POST_DIM)
    # bf16 matmul operands + Mosaic-vs-XLA transcendentals: tolerance 1e-3.
    assert jnp.allclose(out, ref, atol=1e-3, rtol=1e-3), "mismatch vs reference"

    print("KERNEL_OK")
</pallas_src>

<mosaic_0001>
module attributes {stable_mosaic.version = 11 : i64} {
  func.func @_audio_model_kernel(%arg0: i32, %arg1: i32, %arg2: memref<8x1xi32, #tpu.memory_space<vmem>>, %arg3: memref<8x8x16xbf16, #tpu.memory_space<vmem>>, %arg4: memref<16x128xbf16, #tpu.memory_space<vmem>>, %arg5: memref<32x128xbf16, #tpu.memory_space<vmem>>, %arg6: memref<1x128xf32, #tpu.memory_space<vmem>>, %arg7: memref<32x128xbf16, #tpu.memory_space<vmem>>, %arg8: memref<1x128xf32, #tpu.memory_space<vmem>>, %arg9: memref<128x128xbf16, #tpu.memory_space<vmem>>, %arg10: memref<1x128xf32, #tpu.memory_space<vmem>>, %arg11: memref<8x128xf32, #tpu.memory_space<vmem>>, %arg12: memref<64x128xf32, #tpu.memory_space<vmem>>, %arg13: memref<8x32xf32, #tpu.memory_space<vmem>>, %arg14: memref<8x32xf32, #tpu.memory_space<vmem>>) attributes {dimension_semantics = [#tpu.dimension_semantics<parallel>, #tpu.dimension_semantics<arbitrary>], iteration_bounds = array<i64: 1, 1>, scalar_prefetch = 0 : i64, scratch_operands = 3 : i64, tpu.core_type = #tpu.core_type<tc>, window_params = [{transform_indices = @transform_0, window_bounds = array<i64: 8, 1>}, {transform_indices = @transform_1, window_bounds = array<i64: 8, 8, 16>}, {pipeline_mode = #tpu.pipeline_mode<synchronous>, transform_indices = @transform_2, window_bounds = array<i64: 16, 128>}, {pipeline_mode = #tpu.pipeline_mode<synchronous>, transform_indices = @transform_3, window_bounds = array<i64: 32, 128>}, {pipeline_mode = #tpu.pipeline_mode<synchronous>, transform_indices = @transform_4, window_bounds = array<i64: 1, 128>}, {pipeline_mode = #tpu.pipeline_mode<synchronous>, transform_indices = @transform_5, window_bounds = array<i64: 32, 128>}, {pipeline_mode = #tpu.pipeline_mode<synchronous>, transform_indices = @transform_6, window_bounds = array<i64: 1, 128>}, {pipeline_mode = #tpu.pipeline_mode<synchronous>, transform_indices = @transform_7, window_bounds = array<i64: 128, 128>}, {pipeline_mode = #tpu.pipeline_mode<synchronous>, transform_indices = @transform_8, window_bounds = array<i64: 1, 128>}, {transform_indices = @transform_9, window_bounds = array<i64: 8, 128>}]} {
    %c0_i32 = arith.constant 0 : i32
    %0 = arith.cmpi eq, %arg1, %c0_i32 : i32
    %1 = arith.extui %0 : i1 to i32
    %c0_i32_0 = arith.constant 0 : i32
    %2 = arith.cmpi ne, %1, %c0_i32_0 : i32
    scf.if %2 {
      %cst_57 = arith.constant 0.000000e+00 : f32
      %239 = vector.broadcast %cst_57 : f32 to vector<8x32xf32>
      %c0_58 = arith.constant 0 : index
      %c0_59 = arith.constant 0 : index
      %240 = vector.load %arg13[%c0_58, %c0_59] : memref<8x32xf32, #tpu.memory_space<vmem>>, vector<8x32xf32>
      tpu.vector_store %arg13[%c0_58, %c0_59], %239 {strides = array<i32>} : memref<8x32xf32, #tpu.memory_space<vmem>>, vector<8x32xf32>,
      %cst_60 = arith.constant 0.000000e+00 : f32
      %241 = vector.broadcast %cst_60 : f32 to vector<8x32xf32>
      %c0_61 = arith.constant 0 : index
      %c0_62 = arith.constant 0 : index
      %242 = vector.load %arg14[%c0_61, %c0_62] : memref<8x32xf32, #tpu.memory_space<vmem>>, vector<8x32xf32>
      tpu.vector_store %arg14[%c0_61, %c0_62], %241 {strides = array<i32>} : memref<8x32xf32, #tpu.memory_space<vmem>>, vector<8x32xf32>,
    } else {
    }
    %c0 = arith.constant 0 : index
    %c0_1 = arith.constant 0 : index
    %c0_2 = arith.constant 0 : index
    %3 = vector.load %arg3[%c0, %c0_1, %c0_2] : memref<8x8x16xbf16, #tpu.memory_space<vmem>>, vector<8x8x16xbf16>
    %4 = vector.shape_cast %3 : vector<8x8x16xbf16> to vector<64x16xbf16>
    %c0_3 = arith.constant 0 : index
    %c0_4 = arith.constant 0 : index
    %5 = vector.load %arg4[%c0_3, %c0_4] : memref<16x128xbf16, #tpu.memory_space<vmem>>, vector<16x128xbf16>
    %cst = arith.constant dense<0.000000e+00> : vector<64x128xf32>
    %6 = tpu.matmul %4, %5, %cst {dimension_numbers = #tpu.dot_dimension_numbers<[1], [0], [0], [1], [0, 0, 1, 1], [], []>} : vector<64x16xbf16>, vector<16x128xbf16>, vector<64x128xf32> -> vector<64x128xf32>
    %c0_5 = arith.constant 0 : index
    %c0_6 = arith.constant 0 : index
    %7 = vector.load %arg6[%c0_5, %c0_6] : memref<1x128xf32, #tpu.memory_space<vmem>>, vector<1x128xf32>
    %8 = vector.broadcast %7 : vector<1x128xf32> to vector<64x128xf32>
    %9 = arith.addf %6, %8 : vector<64x128xf32>
    %c0_7 = arith.constant 0 : index
    %c0_8 = arith.constant 0 : index
    %10 = vector.load %arg12[%c0_7, %c0_8] : memref<64x128xf32, #tpu.memory_space<vmem>>, vector<64x128xf32>
    tpu.vector_store %arg12[%c0_7, %c0_8], %9 {strides = array<i32>} : memref<64x128xf32, #tpu.memory_space<vmem>>, vector<64x128xf32>,
    %c0_9 = arith.constant 0 : index
    %c0_10 = arith.constant 0 : index
    %11 = vector.load %arg5[%c0_9, %c0_10] : memref<32x128xbf16, #tpu.memory_space<vmem>>, vector<32x128xbf16>
    %c0_11 = arith.constant 0 : index
    %c0_12 = arith.constant 0 : index
    %12 = vector.load %arg2[%c0_11, %c0_12] : memref<8x1xi32, #tpu.memory_space<vmem>>, vector<8x1xi32>
    %13 = vector.shape_cast %12 : vector<8x1xi32> to vector<8x1xi32>
    %14 = vector.broadcast %13 : vector<8x1xi32> to vector<8x32xi32>
    %c8_i32 = arith.constant 8 : i32
    %15 = arith.muli %arg1, %c8_i32 : i32
    %c0_13 = arith.constant 0 : index
    %c0_14 = arith.constant 0 : index
    %16 = vector.load %arg13[%c0_13, %c0_14] : memref<8x32xf32, #tpu.memory_space<vmem>>, vector<8x32xf32>
    %c0_15 = arith.constant 0 : index
    %c0_16 = arith.constant 0 : index
    %17 = vector.load %arg14[%c0_15, %c0_16] : memref<8x32xf32, #tpu.memory_space<vmem>>, vector<8x32xf32>
    %c0_i32_17 = arith.constant 0 : i32
    %c8_i32_18 = arith.constant 8 : i32
    %18 = arith.muli %c0_i32_17, %c8_i32_18 : i32
    %19 = tpu.assume_multiple %18, 8 : i32
    %20 = arith.index_cast %19 : i32 to index
    %c0_19 = arith.constant 0 : index
    %21 = vector.load %arg12[%20, %c0_19] : memref<64x128xf32, #tpu.memory_space<vmem>>, vector<8x128xf32>
    %22 = arith.truncf %16 : vector<8x32xf32> to vector<8x32xbf16>
    %cst_20 = arith.constant dense<0.000000e+00> : vector<8x128xf32>
    %23 = tpu.matmul %22, %11, %cst_20 {dimension_numbers = #tpu.dot_dimension_numbers<[1], [0], [0], [1], [0, 0, 1, 1], [], []>} : vector<8x32xbf16>, vector<32x128xbf16>, vector<8x128xf32> -> vector<8x128xf32>
    %24 = arith.addf %21, %23 : vector<8x128xf32>
    %25 = arith.negf %24 : vector<8x128xf32>
    %26 = math.exp %25 : vector<8x128xf32>
    %cst_21 = arith.constant 1.000000e+00 : f32
    %27 = vector.broadcast %cst_21 : f32 to vector<8x128xf32>
    %28 = arith.addf %27, %26 : vector<8x128xf32>
    %29 = arith.divf %27, %28 : vector<8x128xf32>
    %30 = math.tanh %24 : vector<8x128xf32>
    %31 = vector.extract_strided_slice %29 {offsets = [0, 0], sizes = [8, 32], strides = [1, 1]} : vector<8x128xf32> to vector<8x32xf32>
    %32 = vector.extract_strided_slice %29 {offsets = [0, 32], sizes = [8, 32], strides = [1, 1]} : vector<8x128xf32> to vector<8x32xf32>
    %33 = vector.extract_strided_slice %30 {offsets = [0, 64], sizes = [8, 32], strides = [1, 1]} : vector<8x128xf32> to vector<8x32xf32>
    %34 = vector.extract_strided_slice %29 {offsets = [0, 96], sizes = [8, 32], strides = [1, 1]} : vector<8x128xf32> to vector<8x32xf32>
    %35 = arith.mulf %32, %17 : vector<8x32xf32>
    %36 = arith.mulf %31, %33 : vector<8x32xf32>
    %37 = arith.addf %35, %36 : vector<8x32xf32>
    %38 = math.tanh %37 : vector<8x32xf32>
    %39 = arith.mulf %34, %38 : vector<8x32xf32>
    %40 = arith.addi %15, %c0_i32_17 : i32
    %41 = vector.broadcast %40 : i32 to vector<8x32xi32>
    %42 = arith.cmpi sgt, %14, %41 : vector<8x32xi32>
    %43 = arith.select %42, %39, %16 : vector<8x32xi1>, vector<8x32xf32>
    %44 = arith.select %42, %37, %17 : vector<8x32xi1>, vector<8x32xf32>
    %c1_i32 = arith.constant 1 : i32
    %c8_i32_22 = arith.constant 8 : i32
    %45 = arith.muli %c1_i32, %c8_i32_22 : i32
    %46 = tpu.assume_multiple %45, 8 : i32
    %47 = arith.index_cast %46 : i32 to index
    %c0_23 = arith.constant 0 : index
    %48 = vector.load %arg12[%47, %c0_23] : memref<64x128xf32, #tpu.memory_space<vmem>>, vector<8x128xf32>
    %49 = arith.truncf %43 : vector<8x32xf32> to vector<8x32xbf16>
    %cst_24 = arith.constant dense<0.000000e+00> : vector<8x128xf32>
    %50 = tpu.matmul %49, %11, %cst_24 {dimension_numbers = #tpu.dot_dimension_numbers<[1], [0], [0], [1], [0, 0, 1, 1], [], []>} : vector<8x32xbf16>, vector<32x128xbf16>, vector<8x128xf32> -> vector<8x128xf32>
    %51 = arith.addf %48, %50 : vector<8x128xf32>
    %52 = arith.negf %51 : vector<8x128xf32>
    %53 = math.exp %52 : vector<8x128xf32>
    %cst_25 = arith.constant 1.000000e+00 : f32
    %54 = vector.broadcast %cst_25 : f32 to vector<8x128xf32>
    %55 = arith.addf %54, %53 : vector<8x128xf32>
    %56 = arith.divf %54, %55 : vector<8x128xf32>
    %57 = math.tanh %51 : vector<8x128xf32>
    %58 = vector.extract_strided_slice %56 {offsets = [0, 0], sizes = [8, 32], strides = [1, 1]} : vector<8x128xf32> to vector<8x32xf32>
    %59 = vector.extract_strided_slice %56 {offsets = [0, 32], sizes = [8, 32], strides = [1, 1]} : vector<8x128xf32> to vector<8x32xf32>
    %60 = vector.extract_strided_slice %57 {offsets = [0, 64], sizes = [8, 32], strides = [1, 1]} : vector<8x128xf32> to vector<8x32xf32>
    %61 = vector.extract_strided_slice %56 {offsets = [0, 96], sizes = [8, 32], strides = [1, 1]} : vector<8x128xf32> to vector<8x32xf32>
    %62 = arith.mulf %59, %44 : vector<8x32xf32>
    %63 = arith.mulf %58, %60 : vector<8x32xf32>
    %64 = arith.addf %62, %63 : vector<8x32xf32>
    %65 = math.tanh %64 : vector<8x32xf32>
    %66 = arith.mulf %61, %65 : vector<8x32xf32>
    %67 = arith.addi %15, %c1_i32 : i32
    %68 = vector.broadcast %67 : i32 to vector<8x32xi32>
    %69 = arith.cmpi sgt, %14, %68 : vector<8x32xi32>
    %70 = arith.select %69, %66, %43 : vector<8x32xi1>, vector<8x32xf32>
    %71 = arith.select %69, %64, %44 : vector<8x32xi1>, vector<8x32xf32>
    %c2_i32 = arith.constant 2 : i32
    %c8_i32_26 = arith.constant 8 : i32
    %72 = arith.muli %c2_i32, %c8_i32_26 : i32
    %73 = tpu.assume_multiple %72, 8 : i32
    %74 = arith.index_cast %73 : i32 to index
    %c0_27 = arith.constant 0 : index
    %75 = vector.load %arg12[%74, %c0_27] : memref<64x128xf32, #tpu.memory_space<vmem>>, vector<8x128xf32>
    %76 = arith.truncf %70 : vector<8x32xf32> to vector<8x32xbf16>
    %cst_28 = arith.constant dense<0.000000e+00> : vector<8x128xf32>
    %77 = tpu.matmul %76, %11, %cst_28 {dimension_numbers = #tpu.dot_dimension_numbers<[1], [0], [0], [1], [0, 0, 1, 1], [], []>} : vector<8x32xbf16>, vector<32x128xbf16>, vector<8x128xf32> -> vector<8x128xf32>
    %78 = arith.addf %75, %77 : vector<8x128xf32>
    %79 = arith.negf %78 : vector<8x128xf32>
    %80 = math.exp %79 : vector<8x128xf32>
    %cst_29 = arith.constant 1.000000e+00 : f32
    %81 = vector.broadcast %cst_29 : f32 to vector<8x128xf32>
    %82 = arith.addf %81, %80 : vector<8x128xf32>
    %83 = arith.divf %81, %82 : vector<8x128xf32>
    %84 = math.tanh %78 : vector<8x128xf32>
    %85 = vector.extract_strided_slice %83 {offsets = [0, 0], sizes = [8, 32], strides = [1, 1]} : vector<8x128xf32> to vector<8x32xf32>
    %86 = vector.extract_strided_slice %83 {offsets = [0, 32], sizes = [8, 32], strides = [1, 1]} : vector<8x128xf32> to vector<8x32xf32>
    %87 = vector.extract_strided_slice %84 {offsets = [0, 64], sizes = [8, 32], strides = [1, 1]} : vector<8x128xf32> to vector<8x32xf32>
    %88 = vector.extract_strided_slice %83 {offsets = [0, 96], sizes = [8, 32], strides = [1, 1]} : vector<8x128xf32> to vector<8x32xf32>
    %89 = arith.mulf %86, %71 : vector<8x32xf32>
    %90 = arith.mulf %85, %87 : vector<8x32xf32>
    %91 = arith.addf %89, %90 : vector<8x32xf32>
    %92 = math.tanh %91 : vector<8x32xf32>
    %93 = arith.mulf %88, %92 : vector<8x32xf32>
    %94 = arith.addi %15, %c2_i32 : i32
    %95 = vector.broadcast %94 : i32 to vector<8x32xi32>
    %96 = arith.cmpi sgt, %14, %95 : vector<8x32xi32>
    %97 = arith.select %96, %93, %70 : vector<8x32xi1>, vector<8x32xf32>
    %98 = arith.select %96, %91, %71 : vector<8x32xi1>, vector<8x32xf32>
    %c3_i32 = arith.constant 3 : i32
    %c8_i32_30 = arith.constant 8 : i32
    %99 = arith.muli %c3_i32, %c8_i32_30 : i32
    %100 = tpu.assume_multiple %99, 8 : i32
    %101 = arith.index_cast %100 : i32 to index
    %c0_31 = arith.constant 0 : index
    %102 = vector.load %arg12[%101, %c0_31] : memref<64x128xf32, #tpu.memory_space<vmem>>, vector<8x128xf32>
    %103 = arith.truncf %97 : vector<8x32xf32> to vector<8x32xbf16>
    %cst_32 = arith.constant dense<0.000000e+00> : vector<8x128xf32>
    %104 = tpu.matmul %103, %11, %cst_32 {dimension_numbers = #tpu.dot_dimension_numbers<[1], [0], [0], [1], [0, 0, 1, 1], [], []>} : vector<8x32xbf16>, vector<32x128xbf16>, vector<8x128xf32> -> vector<8x128xf32>
    %105 = arith.addf %102, %104 : vector<8x128xf32>
    %106 = arith.negf %105 : vector<8x128xf32>
    %107 = math.exp %106 : vector<8x128xf32>
    %cst_33 = arith.constant 1.000000e+00 : f32
    %108 = vector.broadcast %cst_33 : f32 to vector<8x128xf32>
    %109 = arith.addf %108, %107 : vector<8x128xf32>
    %110 = arith.divf %108, %109 : vector<8x128xf32>
    %111 = math.tanh %105 : vector<8x128xf32>
    %112 = vector.extract_strided_slice %110 {offsets = [0, 0], sizes = [8, 32], strides = [1, 1]} : vector<8x128xf32> to vector<8x32xf32>
    %113 = vector.extract_strided_slice %110 {offsets = [0, 32], sizes = [8, 32], strides = [1, 1]} : vector<8x128xf32> to vector<8x32xf32>
    %114 = vector.extract_strided_slice %111 {offsets = [0, 64], sizes = [8, 32], strides = [1, 1]} : vector<8x128xf32> to vector<8x32xf32>
    %115 = vector.extract_strided_slice %110 {offsets = [0, 96], sizes = [8, 32], strides = [1, 1]} : vector<8x128xf32> to vector<8x32xf32>
    %116 = arith.mulf %113, %98 : vector<8x32xf32>
    %117 = arith.mulf %112, %114 : vector<8x32xf32>
    %118 = arith.addf %116, %117 : vector<8x32xf32>
    %119 = math.tanh %118 : vector<8x32xf32>
    %120 = arith.mulf %115, %119 : vector<8x32xf32>
    %121 = arith.addi %15, %c3_i32 : i32
    %122 = vector.broadcast %121 : i32 to vector<8x32xi32>
    %123 = arith.cmpi sgt, %14, %122 : vector<8x32xi32>
    %124 = arith.select %123, %120, %97 : vector<8x32xi1>, vector<8x32xf32>
    %125 = arith.select %123, %118, %98 : vector<8x32xi1>, vector<8x32xf32>
    %c4_i32 = arith.constant 4 : i32
    %c8_i32_34 = arith.constant 8 : i32
    %126 = arith.muli %c4_i32, %c8_i32_34 : i32
    %127 = tpu.assume_multiple %126, 8 : i32
    %128 = arith.index_cast %127 : i32 to index
    %c0_35 = arith.constant 0 : index
    %129 = vector.load %arg12[%128, %c0_35] : memref<64x128xf32, #tpu.memory_space<vmem>>, vector<8x128xf32>
    %130 = arith.truncf %124 : vector<8x32xf32> to vector<8x32xbf16>
    %cst_36 = arith.constant dense<0.000000e+00> : vector<8x128xf32>
    %131 = tpu.matmul %130, %11, %cst_36 {dimension_numbers = #tpu.dot_dimension_numbers<[1], [0], [0], [1], [0, 0, 1, 1], [], []>} : vector<8x32xbf16>, vector<32x128xbf16>, vector<8x128xf32> -> vector<8x128xf32>
    %132 = arith.addf %129, %131 : vector<8x128xf32>
    %133 = arith.negf %132 : vector<8x128xf32>
    %134 = math.exp %133 : vector<8x128xf32>
    %cst_37 = arith.constant 1.000000e+00 : f32
    %135 = vector.broadcast %cst_37 : f32 to vector<8x128xf32>
    %136 = arith.addf %135, %134 : vector<8x128xf32>
    %137 = arith.divf %135, %136 : vector<8x128xf32>
    %138 = math.tanh %132 : vector<8x128xf32>
    %139 = vector.extract_strided_slice %137 {offsets = [0, 0], sizes = [8, 32], strides = [1, 1]} : vector<8x128xf32> to vector<8x32xf32>
    %140 = vector.extract_strided_slice %137 {offsets = [0, 32], sizes = [8, 32], strides = [1, 1]} : vector<8x128xf32> to vector<8x32xf32>
    %141 = vector.extract_strided_slice %138 {offsets = [0, 64], sizes = [8, 32], strides = [1, 1]} : vector<8x128xf32> to vector<8x32xf32>
    %142 = vector.extract_strided_slice %137 {offsets = [0, 96], sizes = [8, 32], strides = [1, 1]} : vector<8x128xf32> to vector<8x32xf32>
    %143 = arith.mulf %140, %125 : vector<8x32xf32>
    %144 = arith.mulf %139, %141 : vector<8x32xf32>
    %145 = arith.addf %143, %144 : vector<8x32xf32>
    %146 = math.tanh %145 : vector<8x32xf32>
    %147 = arith.mulf %142, %146 : vector<8x32xf32>
    %148 = arith.addi %15, %c4_i32 : i32
    %149 = vector.broadcast %148 : i32 to vector<8x32xi32>
    %150 = arith.cmpi sgt, %14, %149 : vector<8x32xi32>
    %151 = arith.select %150, %147, %124 : vector<8x32xi1>, vector<8x32xf32>
    %152 = arith.select %150, %145, %125 : vector<8x32xi1>, vector<8x32xf32>
    %c5_i32 = arith.constant 5 : i32
    %c8_i32_38 = arith.constant 8 : i32
    %153 = arith.muli %c5_i32, %c8_i32_38 : i32
    %154 = tpu.assume_multiple %153, 8 : i32
    %155 = arith.index_cast %154 : i32 to index
    %c0_39 = arith.constant 0 : index
    %156 = vector.load %arg12[%155, %c0_39] : memref<64x128xf32, #tpu.memory_space<vmem>>, vector<8x128xf32>
    %157 = arith.truncf %151 : vector<8x32xf32> to vector<8x32xbf16>
    %cst_40 = arith.constant dense<0.000000e+00> : vector<8x128xf32>
    %158 = tpu.matmul %157, %11, %cst_40 {dimension_numbers = #tpu.dot_dimension_numbers<[1], [0], [0], [1], [0, 0, 1, 1], [], []>} : vector<8x32xbf16>, vector<32x128xbf16>, vector<8x128xf32> -> vector<8x128xf32>
    %159 = arith.addf %156, %158 : vector<8x128xf32>
    %160 = arith.negf %159 : vector<8x128xf32>
    %161 = math.exp %160 : vector<8x128xf32>
    %cst_41 = arith.constant 1.000000e+00 : f32
    %162 = vector.broadcast %cst_41 : f32 to vector<8x128xf32>
    %163 = arith.addf %162, %161 : vector<8x128xf32>
    %164 = arith.divf %162, %163 : vector<8x128xf32>
    %165 = math.tanh %159 : vector<8x128xf32>
    %166 = vector.extract_strided_slice %164 {offsets = [0, 0], sizes = [8, 32], strides = [1, 1]} : vector<8x128xf32> to vector<8x32xf32>
    %167 = vector.extract_strided_slice %164 {offsets = [0, 32], sizes = [8, 32], strides = [1, 1]} : vector<8x128xf32> to vector<8x32xf32>
    %168 = vector.extract_strided_slice %165 {offsets = [0, 64], sizes = [8, 32], strides = [1, 1]} : vector<8x128xf32> to vector<8x32xf32>
    %169 = vector.extract_strided_slice %164 {offsets = [0, 96], sizes = [8, 32], strides = [1, 1]} : vector<8x128xf32> to vector<8x32xf32>
    %170 = arith.mulf %167, %152 : vector<8x32xf32>
    %171 = arith.mulf %166, %168 : vector<8x32xf32>
    %172 = arith.addf %170, %171 : vector<8x32xf32>
    %173 = math.tanh %172 : vector<8x32xf32>
    %174 = arith.mulf %169, %173 : vector<8x32xf32>
    %175 = arith.addi %15, %c5_i32 : i32
    %176 = vector.broadcast %175 : i32 to vector<8x32xi32>
    %177 = arith.cmpi sgt, %14, %176 : vector<8x32xi32>
    %178 = arith.select %177, %174, %151 : vector<8x32xi1>, vector<8x32xf32>
    %179 = arith.select %177, %172, %152 : vector<8x32xi1>, vector<8x32xf32>
    %c6_i32 = arith.constant 6 : i32
    %c8_i32_42 = arith.constant 8 : i32
    %180 = arith.muli %c6_i32, %c8_i32_42 : i32
    %181 = tpu.assume_multiple %180, 8 : i32
    %182 = arith.index_cast %181 : i32 to index
    %c0_43 = arith.constant 0 : index
    %183 = vector.load %arg12[%182, %c0_43] : memref<64x128xf32, #tpu.memory_space<vmem>>, vector<8x128xf32>
    %184 = arith.truncf %178 : vector<8x32xf32> to vector<8x32xbf16>
    %cst_44 = arith.constant dense<0.000000e+00> : vector<8x128xf32>
    %185 = tpu.matmul %184, %11, %cst_44 {dimension_numbers = #tpu.dot_dimension_numbers<[1], [0], [0], [1], [0, 0, 1, 1], [], []>} : vector<8x32xbf16>, vector<32x128xbf16>, vector<8x128xf32> -> vector<8x128xf32>
    %186 = arith.addf %183, %185 : vector<8x128xf32>
    %187 = arith.negf %186 : vector<8x128xf32>
    %188 = math.exp %187 : vector<8x128xf32>
    %cst_45 = arith.constant 1.000000e+00 : f32
    %189 = vector.broadcast %cst_45 : f32 to vector<8x128xf32>
    %190 = arith.addf %189, %188 : vector<8x128xf32>
    %191 = arith.divf %189, %190 : vector<8x128xf32>
    %192 = math.tanh %186 : vector<8x128xf32>
    %193 = vector.extract_strided_slice %191 {offsets = [0, 0], sizes = [8, 32], strides = [1, 1]} : vector<8x128xf32> to vector<8x32xf32>
    %194 = vector.extract_strided_slice %191 {offsets = [0, 32], sizes = [8, 32], strides = [1, 1]} : vector<8x128xf32> to vector<8x32xf32>
    %195 = vector.extract_strided_slice %192 {offsets = [0, 64], sizes = [8, 32], strides = [1, 1]} : vector<8x128xf32> to vector<8x32xf32>
    %196 = vector.extract_strided_slice %191 {offsets = [0, 96], sizes = [8, 32], strides = [1, 1]} : vector<8x128xf32> to vector<8x32xf32>
    %197 = arith.mulf %194, %179 : vector<8x32xf32>
    %198 = arith.mulf %193, %195 : vector<8x32xf32>
    %199 = arith.addf %197, %198 : vector<8x32xf32>
    %200 = math.tanh %199 : vector<8x32xf32>
    %201 = arith.mulf %196, %200 : vector<8x32xf32>
    %202 = arith.addi %15, %c6_i32 : i32
    %203 = vector.broadcast %202 : i32 to vector<8x32xi32>
    %204 = arith.cmpi sgt, %14, %203 : vector<8x32xi32>
    %205 = arith.select %204, %201, %178 : vector<8x32xi1>, vector<8x32xf32>
    %206 = arith.select %204, %199, %179 : vector<8x32xi1>, vector<8x32xf32>
    %c7_i32 = arith.constant 7 : i32
    %c8_i32_46 = arith.constant 8 : i32
    %207 = arith.muli %c7_i32, %c8_i32_46 : i32
    %208 = tpu.assume_multiple %207, 8 : i32
    %209 = arith.index_cast %208 : i32 to index
    %c0_47 = arith.constant 0 : index
    %210 = vector.load %arg12[%209, %c0_47] : memref<64x128xf32, #tpu.memory_space<vmem>>, vector<8x128xf32>
    %211 = arith.truncf %205 : vector<8x32xf32> to vector<8x32xbf16>
    %cst_48 = arith.constant dense<0.000000e+00> : vector<8x128xf32>
    %212 = tpu.matmul %211, %11, %cst_48 {dimension_numbers = #tpu.dot_dimension_numbers<[1], [0], [0], [1], [0, 0, 1, 1], [], []>} : vector<8x32xbf16>, vector<32x128xbf16>, vector<8x128xf32> -> vector<8x128xf32>
    %213 = arith.addf %210, %212 : vector<8x128xf32>
    %214 = arith.negf %213 : vector<8x128xf32>
    %215 = math.exp %214 : vector<8x128xf32>
    %cst_49 = arith.constant 1.000000e+00 : f32
    %216 = vector.broadcast %cst_49 : f32 to vector<8x128xf32>
    %217 = arith.addf %216, %215 : vector<8x128xf32>
    %218 = arith.divf %216, %217 : vector<8x128xf32>
    %219 = math.tanh %213 : vector<8x128xf32>
    %220 = vector.extract_strided_slice %218 {offsets = [0, 0], sizes = [8, 32], strides = [1, 1]} : vector<8x128xf32> to vector<8x32xf32>
    %221 = vector.extract_strided_slice %218 {offsets = [0, 32], sizes = [8, 32], strides = [1, 1]} : vector<8x128xf32> to vector<8x32xf32>
    %222 = vector.extract_strided_slice %219 {offsets = [0, 64], sizes = [8, 32], strides = [1, 1]} : vector<8x128xf32> to vector<8x32xf32>
    %223 = vector.extract_strided_slice %218 {offsets = [0, 96], sizes = [8, 32], strides = [1, 1]} : vector<8x128xf32> to vector<8x32xf32>
    %224 = arith.mulf %221, %206 : vector<8x32xf32>
    %225 = arith.mulf %220, %222 : vector<8x32xf32>
    %226 = arith.addf %224, %225 : vector<8x32xf32>
    %227 = math.tanh %226 : vector<8x32xf32>
    %228 = arith.mulf %223, %227 : vector<8x32xf32>
    %229 = arith.addi %15, %c7_i32 : i32
    %230 = vector.broadcast %229 : i32 to vector<8x32xi32>
    %231 = arith.cmpi sgt, %14, %230 : vector<8x32xi32>
    %232 = arith.select %231, %228, %205 : vector<8x32xi1>, vector<8x32xf32>
    %233 = arith.select %231, %226, %206 : vector<8x32xi1>, vector<8x32xf32>
    %c8_i32_50 = arith.constant 8 : i32
    %c0_51 = arith.constant 0 : index
    %c0_52 = arith.constant 0 : index
    %234 = vector.load %arg13[%c0_51, %c0_52] : memref<8x32xf32, #tpu.memory_space<vmem>>, vector<8x32xf32>
    tpu.vector_store %arg13[%c0_51, %c0_52], %232 {strides = array<i32>} : memref<8x32xf32, #tpu.memory_space<vmem>>, vector<8x32xf32>,
    %c0_53 = arith.constant 0 : index
    %c0_54 = arith.constant 0 : index
    %235 = vector.load %arg14[%c0_53, %c0_54] : memref<8x32xf32, #tpu.memory_space<vmem>>, vector<8x32xf32>
    tpu.vector_store %arg14[%c0_53, %c0_54], %233 {strides = array<i32>} : memref<8x32xf32, #tpu.memory_space<vmem>>, vector<8x32xf32>,
    %c0_i32_55 = arith.constant 0 : i32
    %236 = arith.cmpi eq, %arg1, %c0_i32_55 : i32
    %237 = arith.extui %236 : i1 to i32
    %c0_i32_56 = arith.constant 0 : i32
    %238 = arith.cmpi ne, %237, %c0_i32_56 : i32
    scf.if %238 {
      %239 = arith.truncf %232 : vector<8x32xf32> to vector<8x32xbf16>
      %c0_57 = arith.constant 0 : index
      %c0_58 = arith.constant 0 : index
      %240 = vector.load %arg7[%c0_57, %c0_58] : memref<32x128xbf16, #tpu.memory_space<vmem>>, vector<32x128xbf16>
      %cst_59 = arith.constant dense<0.000000e+00> : vector<8x128xf32>
      %241 = tpu.matmul %239, %240, %cst_59 {dimension_numbers = #tpu.dot_dimension_numbers<[1], [0], [0], [1], [0, 0, 1, 1], [], []>} : vector<8x32xbf16>, vector<32x128xbf16>, vector<8x128xf32> -> vector<8x128xf32>
      %c0_60 = arith.constant 0 : index
      %c0_61 = arith.constant 0 : index
      %242 = vector.load %arg8[%c0_60, %c0_61] : memref<1x128xf32, #tpu.memory_space<vmem>>, vector<1x128xf32>
      %243 = vector.broadcast %242 : vector<1x128xf32> to vector<8x128xf32>
      %244 = arith.addf %241, %243 : vector<8x128xf32>
      %245 = arith.truncf %244 : vector<8x128xf32> to vector<8x128xbf16>
      %c0_62 = arith.constant 0 : index
      %c0_63 = arith.constant 0 : index
      %246 = vector.load %arg9[%c0_62, %c0_63] : memref<128x128xbf16, #tpu.memory_space<vmem>>, vector<128x128xbf16>
      %cst_64 = arith.constant dense<0.000000e+00> : vector<8x128xf32>
      %247 = tpu.matmul %245, %246, %cst_64 {dimension_numbers = #tpu.dot_dimension_numbers<[1], [0], [0], [1], [0, 0, 1, 1], [], []>} : vector<8x128xbf16>, vector<128x128xbf16>, vector<8x128xf32> -> vector<8x128xf32>
      %c0_65 = arith.constant 0 : index
      %c0_66 = arith.constant 0 : index
      %248 = vector.load %arg10[%c0_65, %c0_66] : memref<1x128xf32, #tpu.memory_space<vmem>>, vector<1x128xf32>
      %249 = vector.broadcast %248 : vector<1x128xf32> to vector<8x128xf32>
      %250 = arith.addf %247, %249 : vector<8x128xf32>
      %cst_67 = arith.constant 0.000000e+00 : f32
      %251 = vector.broadcast %cst_67 : f32 to vector<8x128xf32>
      %252 = arith.maximumf %250, %251 : vector<8x128xf32>
      %c0_68 = arith.constant 0 : index
      %c0_69 = arith.constant 0 : index
      %253 = vector.load %arg11[%c0_68, %c0_69] : memref<8x128xf32, #tpu.memory_space<vmem>>, vector<8x128xf32>
      tpu.vector_store %arg11[%c0_68, %c0_69], %252 {strides = array<i32>} : memref<8x128xf32, #tpu.memory_space<vmem>>, vector<8x128xf32>,
    } else {
    }
    return
  }
  func.func @transform_0(%arg0: i32, %arg1: i32) -> (i32, i32) {
    %c0_i32 = arith.constant 0 : i32
    %c0_i32_0 = arith.constant 0 : i32
    return %arg0, %c0_i32 : i32, i32
  }
  func.func @transform_1(%arg0: i32, %arg1: i32) -> (i32, i32, i32) {
    %c0_i32 = arith.constant 0 : i32
    %c0_i32_0 = arith.constant 0 : i32
    return %arg1, %arg0, %c0_i32 : i32, i32, i32
  }
  func.func @transform_2(%arg0: i32, %arg1: i32) -> (i32, i32) {
    %c0_i32 = arith.constant 0 : i32
    %c0_i32_0 = arith.constant 0 : i32
    %c0_i32_1 = arith.constant 0 : i32
    return %c0_i32, %c0_i32_0 : i32, i32
  }
  func.func @transform_3(%arg0: i32, %arg1: i32) -> (i32, i32) {
    %c0_i32 = arith.constant 0 : i32
    %c0_i32_0 = arith.constant 0 : i32
    %c0_i32_1 = arith.constant 0 : i32
    return %c0_i32, %c0_i32_0 : i32, i32
  }
  func.func @transform_4(%arg0: i32, %arg1: i32) -> (i32, i32) {
    %c0_i32 = arith.constant 0 : i32
    %c0_i32_0 = arith.constant 0 : i32
    %c0_i32_1 = arith.constant 0 : i32
    return %c0_i32, %c0_i32_0 : i32, i32
  }
  func.func @transform_5(%arg0: i32, %arg1: i32) -> (i32, i32) {
    %c0_i32 = arith.constant 0 : i32
    %c0_i32_0 = arith.constant 0 : i32
    %c0_i32_1 = arith.constant 0 : i32
    return %c0_i32, %c0_i32_0 : i32, i32
  }
  func.func @transform_6(%arg0: i32, %arg1: i32) -> (i32, i32) {
    %c0_i32 = arith.constant 0 : i32
    %c0_i32_0 = arith.constant 0 : i32
    %c0_i32_1 = arith.constant 0 : i32
    return %c0_i32, %c0_i32_0 : i32, i32
  }
  func.func @transform_7(%arg0: i32, %arg1: i32) -> (i32, i32) {
    %c0_i32 = arith.constant 0 : i32
    %c0_i32_0 = arith.constant 0 : i32
    %c0_i32_1 = arith.constant 0 : i32
    return %c0_i32, %c0_i32_0 : i32, i32
  }
  func.func @transform_8(%arg0: i32, %arg1: i32) -> (i32, i32) {
    %c0_i32 = arith.constant 0 : i32
    %c0_i32_0 = arith.constant 0 : i32
    %c0_i32_1 = arith.constant 0 : i32
    return %c0_i32, %c0_i32_0 : i32, i32
  }
  func.func @transform_9(%arg0: i32, %arg1: i32) -> (i32, i32) {
    %c0_i32 = arith.constant 0 : i32
    %c0_i32_0 = arith.constant 0 : i32
    return %arg0, %c0_i32 : i32, i32
  }
}

</mosaic_0001>

<bundles_post_ra>
// kernel: tpu_custom_call.1
= control target key start
LH: loop header
LB: loop body
LE: loop exit
PB: predicated region body
PF: predicated region fallthrough
CT: control target
= control target key end

     0   :  { %14 = vsyncpa [#allocation6], 0  ;;  %s1842_s0 = inlined_call_operand.vmem [shape: s32[8,1], index: 0, kind: input, shape index: {}]   ;;  %s1843_s1 = inlined_call_operand.hbm [shape: bf16[8,8,16], index: 1, kind: input, shape index: {}]   ;;  %s1844_s2 = inlined_call_operand.hbm [shape: bf16[16,128], index: 2, kind: input, shape index: {}]   ;;  %s1845_s3 = inlined_call_operand.vmem [shape: bf16[32,128], index: 3, kind: input, shape index: {}]   ;;  %s1846_s4 = inlined_call_operand.vmem [shape: f32[1,128], index: 4, kind: input, shape index: {}]   ;;  %s1847_s5 = inlined_call_operand.hbm [shape: bf16[32,128], index: 5, kind: input, shape index: {}]   ;;  %s1848_s6 = inlined_call_operand.vmem [shape: f32[1,128], index: 6, kind: input, shape index: {}]   ;;  %s1849_s7 = inlined_call_operand.hbm [shape: bf16[128,128], index: 7, kind: input, shape index: {}]   ;;  %s1850_s8 = inlined_call_operand.vmem [shape: f32[1,128], index: 8, kind: input, shape index: {}]   ;;  %s1851_s9 = inlined_call_operand.hbm [shape: f32[8,128], index: 9, kind: output, shape index: {}]  }
   0x1   :  { %15 = vsyncpa [#allocation9], 0 }
   0x2   :  { %16 = vsyncpa [#allocation12], 0 }
   0x3   :  { %17 = vsyncpa [#allocation7], 0  ;;  %s1495_s30 = smov [#allocation8]   ;;  %s1496_s11 = smov [#allocation5]  }
   0x4   :  { %s37_s10 = sshll.u32 %s1495_s30, 4  ;;  %s25_s12 = sshll.u32 %s1496_s11, 4  ;;  %s38_s10 = int_to_ptr.vmem [resolvable:$true] %s37_s10  ;;  %s1557_s12 = int_to_ptr.vmem [resolvable:$true] %s25_s12 }
   0x5   :  { %s1377_s15 = scalar_lea.hbm %s1844_s2, 128 }
   0x6   :  { %p1378_p0 = scmp.ne.s32.totalorder %s1844_s2, %s1377_s15  ;;  %p1381_p1 = scmp.lt.u32.totalorder %s1377_s15, %s1844_s2 }
   0x8   :  { %p1383_p2 = pnand %p1381_p1, %p1378_p0 }
   0xa   :  { %1386 = shalt.err (!%p1383_p2)
}
   0xb   :  { %s1387_s20 = scalar_lea.vmem %s38_s10, 128  ;;  %p1392_p4 = scmp.lt.s32.totalorder %s38_s10, %s38_s10 }
   0xc   :  { %p1388_p3 = scmp.ne.s32.totalorder %s38_s10, %s1387_s20  ;;  %p1393_p5 = scmp.lt.s32.totalorder %s1387_s20, %s1387_s20 }
   0xe   :  { %p1394_p6 = por %p1393_p5, %p1392_p4 }
  0x10   :  { %p1395_p7 = pnand %p1394_p6, %p1388_p3 }
  0x12   :  { %1398 = shalt.err (!%p1395_p7)
}
  0x13   :  { %s1497_s21 = smov 64   ;;  %s1498_s22 = smov 4  }
  0x14   :  { %43 = dma.hbm_to_vmem [thread:$0]  %s1844_s2, 128, %s38_s10, [#allocation9], %s1497_s21, %s1497_s21, %s1498_s22  }
  0x15   :  { %s1399_s27 = scalar_lea.hbm %s1843_s1, 512 }
  0x16   :  { %p1400_p8 = scmp.ne.s32.totalorder %s1843_s1, %s1399_s27  ;;  %p1403_p9 = scmp.lt.u32.totalorder %s1399_s27, %s1843_s1 }
  0x18   :  { %p1405_p10 = pnand %p1403_p9, %p1400_p8 }
  0x1a   :  { %1408 = shalt.err (!%p1405_p10)
}
  0x1b   :  { %s1409_s13 = scalar_lea.vmem %s1557_s12, 512  ;;  %p1414_p12 = scmp.lt.s32.totalorder %s1557_s12, %s1557_s12 }
  0x1c   :  { %p1410_p11 = scmp.ne.s32.totalorder %s1557_s12, %s1409_s13  ;;  %p1415_p13 = scmp.lt.s32.totalorder %s1409_s13, %s1409_s13 }
  0x1e   :  { %p1416_p0 = por %p1415_p13, %p1414_p12 }
  0x20   :  { %p1417_p1 = pnand %p1416_p0, %p1410_p11 }
  0x22   :  { %1420 = shalt.err (!%p1417_p1)
}
  0x23   :  { %31 = dma.hbm_to_vmem [thread:$0]  %s1843_s1, 512, %s1557_s12, [#allocation6], %s1497_s21, %s1497_s21, %s1498_s22  }
  0x24   :  { %s1499_s14 = smov [#allocation10]   ;;  %s1500_s16 = smov [#allocation11]  }
  0x25   :  { %s53_s15 = sshll.u32 %s1499_s14, 4  ;;  %s67_s17 = sshll.u32 %s1500_s16, 4  ;;  %s54_s15 = int_to_ptr.vmem [resolvable:$true] %s53_s15  ;;  %s1594_s17 = int_to_ptr.vmem [resolvable:$true] %s67_s17 }
  0x26   :  { %s1421_s20 = scalar_lea.hbm %s1847_s5, 256 }
  0x27   :  { %p1422_p2 = scmp.ne.s32.totalorder %s1847_s5, %s1421_s20  ;;  %p1425_p3 = scmp.lt.u32.totalorder %s1421_s20, %s1847_s5 }
  0x29   :  { %p1427_p4 = pnand %p1425_p3, %p1422_p2 }
  0x2b   :  { %1430 = shalt.err (!%p1427_p4)
}
  0x2c   :  { %s1431_s1 = scalar_lea.vmem %s54_s15, 256  ;;  %p1436_p6 = scmp.lt.s32.totalorder %s54_s15, %s54_s15 }
  0x2d   :  { %p1432_p5 = scmp.ne.s32.totalorder %s54_s15, %s1431_s1  ;;  %p1437_p7 = scmp.lt.s32.totalorder %s1431_s1, %s1431_s1 }
  0x2f   :  { %p1438_p8 = por %p1437_p7, %p1436_p6 }
  0x31   :  { %p1439_p9 = pnand %p1438_p8, %p1432_p5 }
  0x33   :  { %1442 = shalt.err (!%p1439_p9)
}
  0x34   :  { %59 = dma.hbm_to_vmem [thread:$0]  %s1847_s5, 256, %s54_s15, [#allocation9], %s1497_s21, %s1497_s21, %s1498_s22  }
  0x35   :  { %s1443_s30 = scalar_lea.hbm %s1849_s7, 1024 }
  0x36   :  { %p1444_p10 = scmp.ne.s32.totalorder %s1849_s7, %s1443_s30  ;;  %p1447_p11 = scmp.lt.u32.totalorder %s1443_s30, %s1849_s7 }
  0x38   :  { %p1449_p12 = pnand %p1447_p11, %p1444_p10 }
  0x3a   :  { %1452 = shalt.err (!%p1449_p12)
}
  0x3b   :  { %s1453_s14 = scalar_lea.vmem %s1594_s17, 1024  ;;  %p1458_p0 = scmp.lt.s32.totalorder %s1594_s17, %s1594_s17 }
  0x3c   :  { %p1454_p13 = scmp.ne.s32.totalorder %s1594_s17, %s1453_s14  ;;  %p1459_p1 = scmp.lt.s32.totalorder %s1453_s14, %s1453_s14 }
  0x3e   :  { %p1460_p2 = por %p1459_p1, %p1458_p0 }
  0x40   :  { %p1461_p3 = pnand %p1460_p2, %p1454_p13 }
  0x42   :  { %1464 = shalt.err (!%p1461_p3)
}
  0x43   :  { %73 = dma.hbm_to_vmem [thread:$0]  %s1849_s7, 1024, %s1594_s17, [#allocation12], %s1497_s21, %s1497_s21, %s1498_s22  }
  0x44   :  { %1487 = dma.done.wait [#allocation6], 512  }
  0x45   :  { %1488 = vsyncadd [#allocation6], 4294966784 }
  0x46   :  { %1489 = dma.done.wait [#allocation9], 384  }
  0x47   :  { %1490 = vsyncadd [#allocation9], 4294966912 }
  0x48   :  { %1491 = dma.done.wait [#allocation12], 1024  }
  0x49   :  { %1492 = vsyncadd [#allocation12], 4294966272  ;;  %vm93_vm0 = vcmask 261120   ;;  %v1501_v0 = vmov 0.0   ;;  %vm1502_vm1 = vmmov 0   ;;  %v1296_v1 = vld [vmem:[#allocation8] sm:$0xff]  }
  0x4a   :  { %94 = vst.msk [vmem:[#allocation3] sm:$0xff] %vm93_vm0, %v1501_v0  ;;  %95 = vst.msk [vmem:[#allocation4] sm:$0xff] %vm93_vm0, %v1501_v0  ;;  %1214 = vmatprep.subr.bf16.mxu1 %v1501_v0  ;;  %1218 = vmatprep.mubr.msk.bf16.mxu1 %vm1502_vm1, %v1501_v0  ;;  %vm139_vm2 = vcmask 130048   ;;  %v1297_v2 = vld [vmem:[#allocation5] sm:$0xff]   ;;  %v1298_v3 = vld [vmem:[#allocation5 + $0x8] sm:$0xff]   ;;  %v1503_v32 = vmov 0  }
  0x4b   :  { %1180 = vmatprep.subr.bf16.mxu0 %v1296_v1  ;;  %1182 = vmatprep.mubr.msk.bf16.mxu0 %vm139_vm2, %v1297_v2  ;;  %v1642_v4 = vld [vmem:[%s1845_s3] sm:$0xff]   ;;  %v1300_v5 = vld [vmem:[#allocation5 + $0x10] sm:$0xff]   ;;  %v1653_v6 = vld [vmem:[%s1845_s3 + $0x8] sm:$0xff]   ;;  %s1505_s23 = smov 96   ;;  %s1506_s26 = smov [#allocation13]  }
  0x4c   :  { %1181 = vmatpush3.bf16.msra.mxu0 %v1296_v1  ;;  %1215 = vmatpush3.bf16.msra.mxu1 %v1642_v4  ;;  %v1301_v7 = vld [vmem:[#allocation5 + $0x18] sm:$0xff]   ;;  %v1098_v10 = vld [vmem:[%s1846_s4] ss:$0 sm:$0xff]  ;;  %s1504_s4 = smov 32   ;;  %s1087_s1 = sshll.u32 %s1506_s26, 4  ;;  %s1088_s1 = int_to_ptr.vmem [resolvable:$true] %s1087_s1 }
  0x4d   :  { %1190 = vmatprep.subr.bf16.mxu0 %v1501_v0  ;;  %1216 = vmatprep.subr.bf16.mxu1 %v1501_v0  ;;  %v229_v41 = vld [vmem:[%s1842_s0] sm:$0xff]  ;;  %p1470_p5 = scmp.lt.s32.totalorder %s1088_s1, %s1088_s1 }
  0x4e   :  { %1294 = vset.pattern.permute.xlu1 %v1503_v32  ;;  %1295 = vset.pattern.permute.xlu0 %v1503_v32 }
  0x4f   :  { %1183 = vmatmul.mubr.msk.bf16.vlgmr.msra.gmra.mrb[0].mxu0 %vm139_vm2, %v1298_v3 }
  0x50   :  { %1191 = vmatpush3.bf16.msra.mxu0 %v1642_v4  ;;  %1186 = vmatprep.mubr.msk.bf16.mxu0 %vm139_vm2, %v1300_v5 }
  0x51   :  { %1192 = vmatprep.subr.bf16.mxu0 %v1501_v0  ;;  %1217 = vmatpush3.bf16.msra.mxu1 %v1653_v6  ;;  %v234_v8 = vld [vmem:[#allocation3] sm:$0xff]  ;;  %v235_v34 = vld [vmem:[#allocation4] sm:$0xff] }
  0x52   :  { %1230 = vmatprep.subr.bf16.mxu1 %v1501_v0  ;;  %v237_v9 = vpack.c.bf16 %v234_v8, %v234_v8 }
  0x54   :  { %1193 = vmatpush3.bf16.msra.mxu0 %v1653_v6 }
  0x55   :  { %1198 = vmatprep.subr.bf16.mxu0 %v1501_v0 }
  0x57   :  { %1187 = vmatmul.mubr.msk.bf16.gmra.mrb[4].mxu0 %vm139_vm2, %v1301_v7 }
  0x58   :  { %1194 = vmatprep.mubr.msk.bf16.mxu0 %vm1502_vm1, %v1501_v0 }
  0x5f   :  { %1195 = vmatmul.mubr.msk.bf16.vlgmr.msra.gmra.mrb[8].mxu0 %vm93_vm0, %v237_v9 }
  0x60   :  { %1199 = vmatpush3.bf16.msra.mxu0 %v1642_v4  ;;  %1202 = vmatprep.mubr.msk.bf16.mxu0 %vm1502_vm1, %v1501_v0 }
  0x61   :  { %1200 = vmatprep.subr.bf16.mxu0 %v1501_v0 }
  0x64   :  { %1201 = vmatpush3.bf16.msra.mxu0 %v1653_v6 }
  0x65   :  { %1206 = vmatprep.subr.bf16.mxu0 %v1501_v0 }
 0x122   :  { %v1184_v11 = vpop.f32.mrb[0].mxu0 }
 0x123   :  { %v1673_v12 = vadd.f32 %v1184_v11, %v1098_v10  ;;  %v186_v13 = vpop.f32.mrb[1].mxu0 }
 0x124   :  { %v1185_v14 = vpop.f32.mrb[2].mxu0  ;;  %v187_v26 = vadd.f32 %v1098_v10, %v186_v13 }
 0x125   :  { %v1675_v15 = vadd.f32 %v1185_v14, %v1098_v10  ;;  %v189_v16 = vpop.f32.mrb[3].mxu0 }
 0x126   :  { %v190_v17 = vadd.f32 %v1098_v10, %v189_v16 }
 0x12a   :  { %v1188_v18 = vpop.f32.mrb[4].mxu0 }
 0x12b   :  { %v1677_v19 = vadd.f32 %v1188_v18, %v1098_v10  ;;  %v202_v20 = vpop.f32.mrb[5].mxu0 }
 0x12c   :  { %v1679_v21 = vadd.f32 %v1098_v10, %v202_v20  ;;  %v1189_v22 = vpop.f32.mrb[6].mxu0 }
 0x12d   :  { %v1681_v23 = vadd.f32 %v1189_v22, %v1098_v10  ;;  %v205_v24 = vpop.f32.mrb[7].mxu0 }
 0x12e   :  { %v1683_v25 = vadd.f32 %v1098_v10, %v205_v24 }
 0x132   :  { %v288_v27 = vpop.f32.mrb[8].mxu0 }
 0x133   :  { %v294_v28 = vadd.f32 %v288_v27, %v187_v26  ;;  %v1196_v29 = vpop.f32.mrb[9].mxu0 }
 0x134   :  { %v291_v30 = vpop.f32.mrb[10].mxu0 }
 0x135   :  { %v1197_v31 = vpop.f32.mrb[11].mxu0  ;;  %1313 = vtanh.f32 %v294_v28  ;;  %v1111_v35 = vmul.f32 -1.442695, %v294_v28 }
 0x137   :  { %1315 = vpow2.f32 %v1111_v35 }
 0x13f   :  { %v1314_v33 = vpop.eup %1313 }
 0x140   :  { %308 = vrot.lane.b32.xlu0 %v1314_v33, %s1497_s21 }
 0x141   :  { %v1316_v36 = vpop.eup %1315 }
 0x142   :  { %v298_v37 = vadd.f32 1.0, %v1316_v36 }
 0x144   :  { %303 = vrot.lane.b32.xlu0 %v235_v34, %s1504_s4  ;;  %1317 = vrcp.f32 %v298_v37 }
 0x14e   :  { %v1318_v38 = vpop.eup %1317 }
 0x1b2   :  { %v309_v39 = vpop.permute.xlu0 %308 }
 0x1b3   :  { %v311_v40 = vmul.f32 %v1318_v38, %v309_v39 }
 0x1b5   :  { %313 = vrot.lane.b32.xlu1 %v311_v40, %s1504_s4 }
 0x1b6   :  { %v304_v42 = vpop.permute.xlu0 %303 }
 0x1b7   :  { %v306_v43 = vmul.f32 %v1318_v38, %v304_v42 }
 0x1b9   :  { %231 = vperm.xlu1 %1294, %v229_v41  }
 0x1bd   :  { %326 = vrot.lane.b32.xlu1 %v234_v8, %s1505_s23 }
 0x227   :  { %v314_v44 = vpop.permute.xlu1 %313 }
 0x228   :  { %v316_v45 = vadd.f32 %v314_v44, %v306_v43 }
 0x22a   :  { %1319 = vtanh.f32 %v316_v45 }
 0x234   :  { %v1320_v46 = vpop.eup %1319 }
 0x235   :  { %319 = vrot.lane.b32.xlu0 %v1320_v46, %s1497_s21 }
 0x238   :  { %v1693_v47 = vpop.permute.xlu1 %231 }
 0x239   :  { %vm324_vm3 = vcmp.gt.s32.totalorder %v1693_v47, 0  ;;  %vm407_vm4 = vcmp.gt.s32.totalorder %v1693_v47, 1  ;;  %vm486_vm5 = vcmp.gt.s32.totalorder %v1693_v47, 2  ;;  %vm565_vm6 = vcmp.gt.s32.totalorder %v1693_v47, 3 }
 0x23a   :  { %v330_v3 = vsel %vm324_vm3, %v316_v45, %v304_v42  ;;  %vm644_vm7 = vcmp.gt.s32.totalorder %v1693_v47, 4  ;;  %vm723_vm8 = vcmp.gt.s32.totalorder %v1693_v47, 5  ;;  %vm802_vm9 = vcmp.gt.s32.totalorder %v1693_v47, 6 }
 0x23b   :  { %vm881_vm10 = vcmp.gt.s32.totalorder %v1693_v47, 7  ;;  %v1310_v47 = vld [vmem:[#allocation11 + $0x28] sm:$0xff]  }
 0x23c   :  { %v327_v49 = vpop.permute.xlu1 %326 }
 0x2a7   :  { %v320_v48 = vpop.permute.xlu0 %319 }
 0x2a8   :  { %v322_v50 = vmul.f32 %v1318_v38, %v320_v48 }
 0x2aa   :  { %v329_v51 = vsel %vm324_vm3, %v322_v50, %v327_v49 }
 0x2ab   :  { %v333_v52 = vpack.c.bf16 %v329_v51, %v329_v51 }
 0x2ad   :  { %335 = vrot.lane.b32.xlu0 %v333_v52, %s1504_s4 }
 0x31f   :  { %v336_v53 = vpop.permute.xlu0 %335 }
 0x320   :  { %1203 = vmatmul.mubr.msk.bf16.vlgmr.msra.gmra.mrb[12].mxu0 %vm93_vm0, %v336_v53 }
 0x321   :  { %1207 = vmatpush3.bf16.msra.mxu0 %v1642_v4  ;;  %1210 = vmatprep.mubr.msk.bf16.mxu0 %vm1502_vm1, %v1501_v0 }
 0x322   :  { %1208 = vmatprep.subr.bf16.mxu0 %v1501_v0 }
 0x325   :  { %1209 = vmatpush3.bf16.msra.mxu0 %v1653_v6 }
 0x326   :  { %1222 = vmatprep.subr.bf16.mxu0 %v1501_v0 }
 0x3f3   :  { %v374_v54 = vpop.f32.mrb[12].mxu0 }
 0x3f4   :  { %v380_v55 = vadd.f32 %v374_v54, %v190_v17  ;;  %v1204_v56 = vpop.f32.mrb[13].mxu0 }
 0x3f5   :  { %v377_v57 = vpop.f32.mrb[14].mxu0 }
 0x3f6   :  { %1321 = vtanh.f32 %v380_v55  ;;  %v1205_v58 = vpop.f32.mrb[15].mxu0  ;;  %v1113_v60 = vmul.f32 -1.442695, %v380_v55 }
 0x3f8   :  { %1323 = vpow2.f32 %v1113_v60 }
 0x400   :  { %v1322_v59 = vpop.eup %1321 }
 0x401   :  { %390 = vrot.lane.b32.xlu1 %v1322_v59, %s1497_s21 }
 0x402   :  { %v1324_v61 = vpop.eup %1323 }
 0x403   :  { %v384_v62 = vadd.f32 1.0, %v1324_v61 }
 0x405   :  { %1325 = vrcp.f32 %v384_v62 }
 0x40f   :  { %v1326_v63 = vpop.eup %1325 }
 0x410   :  { %v388_v5 = vmul.f32 %v1326_v63, %v330_v3 }
 0x473   :  { %v391_v1 = vpop.permute.xlu1 %390 }
 0x474   :  { %v393_v2 = vmul.f32 %v1326_v63, %v391_v1 }
 0x476   :  { %395 = vrot.lane.b32.xlu0 %v393_v2, %s1504_s4 }
 0x4e8   :  { %v396_v7 = vpop.permute.xlu0 %395 }
 0x4e9   :  { %v398_v8 = vadd.f32 %v396_v7, %v388_v5 }
 0x4eb   :  { %1327 = vtanh.f32 %v398_v8 }
 0x4f5   :  { %v1328_v9 = vpop.eup %1327 }
 0x4f6   :  { %401 = vrot.lane.b32.xlu1 %v1328_v9, %s1497_s21 }
 0x568   :  { %v402_v10 = vpop.permute.xlu1 %401 }
 0x569   :  { %v404_v11 = vmul.f32 %v1326_v63, %v402_v10 }
 0x56b   :  { %v408_v13 = vsel %vm407_vm4, %v404_v11, %v329_v51 }
 0x56c   :  { %v412_v14 = vpack.c.bf16 %v408_v13, %v408_v13 }
 0x56e   :  { %414 = vrot.lane.b32.xlu0 %v412_v14, %s1504_s4 }
 0x5e0   :  { %v415_v16 = vpop.permute.xlu0 %414 }
 0x5e1   :  { %1211 = vmatmul.mubr.msk.bf16.vlgmr.msra.gmra.mrb[16].mxu0 %vm93_vm0, %v415_v16 }
 0x5e2   :  { %1223 = vmatpush3.bf16.msra.mxu0 %v1642_v4  ;;  %1226 = vmatprep.mubr.msk.bf16.mxu0 %vm1502_vm1, %v1501_v0 }
 0x5e3   :  { %1224 = vmatprep.subr.bf16.mxu0 %v1501_v0 }
 0x5e6   :  { %1225 = vmatpush3.bf16.msra.mxu0 %v1653_v6 }
 0x5e7   :  { %1238 = vmatprep.subr.bf16.mxu0 %v1501_v0 }
 0x6b4   :  { %v453_v17 = vpop.f32.mrb[16].mxu0 }
 0x6b5   :  { %v459_v18 = vadd.f32 %v453_v17, %v1673_v12  ;;  %v1212_v20 = vpop.f32.mrb[17].mxu0  ;;  %v409_v12 = vsel %vm407_vm4, %v398_v8, %v330_v3 }
 0x6b6   :  { %v456_v22 = vpop.f32.mrb[18].mxu0 }
 0x6b7   :  { %1329 = vtanh.f32 %v459_v18  ;;  %v1213_v24 = vpop.f32.mrb[19].mxu0  ;;  %v1115_v27 = vmul.f32 -1.442695, %v459_v18 }
 0x6b9   :  { %1331 = vpow2.f32 %v1115_v27 }
 0x6c1   :  { %v1330_v26 = vpop.eup %1329 }
 0x6c2   :  { %469 = vrot.lane.b32.xlu1 %v1330_v26, %s1497_s21 }
 0x6c3   :  { %v1332_v28 = vpop.eup %1331 }
 0x6c4   :  { %v463_v29 = vadd.f32 1.0, %v1332_v28 }
 0x6c6   :  { %1333 = vrcp.f32 %v463_v29 }
 0x6d0   :  { %v1334_v30 = vpop.eup %1333 }
 0x6d1   :  { %v467_v33 = vmul.f32 %v1334_v30, %v409_v12 }
 0x734   :  { %v470_v31 = vpop.permute.xlu1 %469 }
 0x735   :  { %v472_v32 = vmul.f32 %v1334_v30, %v470_v31 }
 0x737   :  { %474 = vrot.lane.b32.xlu0 %v472_v32, %s1504_s4 }
 0x7a9   :  { %v475_v34 = vpop.permute.xlu0 %474 }
 0x7aa   :  { %v477_v35 = vadd.f32 %v475_v34, %v467_v33 }
 0x7ac   :  { %1335 = vtanh.f32 %v477_v35 }
 0x7b6   :  { %v1336_v36 = vpop.eup %1335 }
 0x7b7   :  { %480 = vrot.lane.b32.xlu1 %v1336_v36, %s1497_s21 }
 0x829   :  { %v481_v37 = vpop.permute.xlu1 %480 }
 0x82a   :  { %v483_v38 = vmul.f32 %v1334_v30, %v481_v37 }
 0x82c   :  { %v487_v39 = vsel %vm486_vm5, %v483_v38, %v408_v13 }
 0x82d   :  { %v491_v40 = vpack.c.bf16 %v487_v39, %v487_v39 }
 0x82f   :  { %493 = vrot.lane.b32.xlu0 %v491_v40, %s1504_s4 }
 0x8a1   :  { %v494_v41 = vpop.permute.xlu0 %493 }
 0x8a2   :  { %1219 = vmatmul.mubr.msk.bf16.vlgmr.msra.gmra.mrb[0].mxu1 %vm93_vm0, %v494_v41 }
 0x8a3   :  { %1231 = vmatpush3.bf16.msra.mxu1 %v1642_v4  ;;  %1234 = vmatprep.mubr.msk.bf16.mxu1 %vm1502_vm1, %v1501_v0 }
 0x8a4   :  { %1232 = vmatprep.subr.bf16.mxu1 %v1501_v0 }
 0x8a7   :  { %1233 = vmatpush3.bf16.msra.mxu1 %v1653_v6 }
 0x8a8   :  { %1246 = vmatprep.subr.bf16.mxu1 %v1501_v0 }
 0x975   :  { %v532_v42 = vpop.f32.mrb[0].mxu1 }
 0x976   :  { %v538_v43 = vadd.f32 %v532_v42, %v1675_v15  ;;  %v1220_v44 = vpop.f32.mrb[1].mxu1  ;;  %v488_v15 = vsel %vm486_vm5, %v477_v35, %v409_v12 }
 0x977   :  { %v535_v45 = vpop.f32.mrb[2].mxu1 }
 0x978   :  { %1337 = vtanh.f32 %v538_v43  ;;  %v1221_v46 = vpop.f32.mrb[3].mxu1  ;;  %v1117_v49 = vmul.f32 -1.442695, %v538_v43 }
 0x97a   :  { %1339 = vpow2.f32 %v1117_v49 }
 0x982   :  { %v1338_v48 = vpop.eup %1337 }
 0x983   :  { %548 = vrot.lane.b32.xlu1 %v1338_v48, %s1497_s21 }
 0x984   :  { %v1340_v50 = vpop.eup %1339 }
 0x985   :  { %v542_v51 = vadd.f32 1.0, %v1340_v50 }
 0x987   :  { %1341 = vrcp.f32 %v542_v51 }
 0x991   :  { %v1342_v52 = vpop.eup %1341 }
 0x992   :  { %v546_v55 = vmul.f32 %v1342_v52, %v488_v15 }
 0x9f5   :  { %v549_v53 = vpop.permute.xlu1 %548 }
 0x9f6   :  { %v551_v54 = vmul.f32 %v1342_v52, %v549_v53 }
 0x9f8   :  { %553 = vrot.lane.b32.xlu0 %v551_v54, %s1504_s4 }
 0xa6a   :  { %v554_v56 = vpop.permute.xlu0 %553 }
 0xa6b   :  { %v556_v57 = vadd.f32 %v554_v56, %v546_v55 }
 0xa6d   :  { %1343 = vtanh.f32 %v556_v57 }
 0xa77   :  { %v1344_v58 = vpop.eup %1343 }
 0xa78   :  { %559 = vrot.lane.b32.xlu1 %v1344_v58, %s1497_s21 }
 0xaea   :  { %v560_v59 = vpop.permute.xlu1 %559 }
 0xaeb   :  { %v562_v60 = vmul.f32 %v1342_v52, %v560_v59 }
 0xaed   :  { %v566_v61 = vsel %vm565_vm6, %v562_v60, %v487_v39 }
 0xaee   :  { %v570_v62 = vpack.c.bf16 %v566_v61, %v566_v61 }
 0xaf0   :  { %572 = vrot.lane.b32.xlu0 %v570_v62, %s1504_s4 }
 0xb62   :  { %v573_v63 = vpop.permute.xlu0 %572 }
 0xb63   :  { %1227 = vmatmul.mubr.msk.bf16.vlgmr.msra.gmra.mrb[20].mxu0 %vm93_vm0, %v573_v63 }
 0xb64   :  { %1239 = vmatpush3.bf16.msra.mxu0 %v1642_v4  ;;  %1242 = vmatprep.mubr.msk.bf16.mxu0 %vm1502_vm1, %v1501_v0 }
 0xb65   :  { %1240 = vmatprep.subr.bf16.mxu0 %v1501_v0 }
 0xb68   :  { %1241 = vmatpush3.bf16.msra.mxu0 %v1653_v6 }
 0xb69   :  { %1254 = vmatprep.subr.bf16.mxu0 %v1501_v0 }
 0xc36   :  { %v611_v1 = vpop.f32.mrb[20].mxu0 }
 0xc37   :  { %v617_v2 = vadd.f32 %v611_v1, %v1679_v21  ;;  %v1228_v3 = vpop.f32.mrb[21].mxu0  ;;  %v567_v21 = vsel %vm565_vm6, %v556_v57, %v488_v15 }
 0xc38   :  { %v614_v5 = vpop.f32.mrb[22].mxu0 }
 0xc39   :  { %1345 = vtanh.f32 %v617_v2  ;;  %v1229_v7 = vpop.f32.mrb[23].mxu0  ;;  %v1119_v9 = vmul.f32 -1.442695, %v617_v2 }
 0xc3b   :  { %1347 = vpow2.f32 %v1119_v9 }
 0xc43   :  { %v1346_v8 = vpop.eup %1345 }
 0xc44   :  { %627 = vrot.lane.b32.xlu1 %v1346_v8, %s1497_s21 }
 0xc45   :  { %v1348_v10 = vpop.eup %1347 }
 0xc46   :  { %v621_v11 = vadd.f32 1.0, %v1348_v10 }
 0xc48   :  { %1349 = vrcp.f32 %v621_v11 }
 0xc52   :  { %v1350_v13 = vpop.eup %1349 }
 0xc53   :  { %v625_v17 = vmul.f32 %v1350_v13, %v567_v21 }
 0xcb6   :  { %v628_v14 = vpop.permute.xlu1 %627 }
 0xcb7   :  { %v630_v16 = vmul.f32 %v1350_v13, %v628_v14 }
 0xcb9   :  { %632 = vrot.lane.b32.xlu0 %v630_v16, %s1504_s4 }
 0xd2b   :  { %v633_v18 = vpop.permute.xlu0 %632 }
 0xd2c   :  { %v635_v20 = vadd.f32 %v633_v18, %v625_v17 }
 0xd2e   :  { %1351 = vtanh.f32 %v635_v20 }
 0xd38   :  { %v1352_v22 = vpop.eup %1351 }
 0xd39   :  { %638 = vrot.lane.b32.xlu1 %v1352_v22, %s1497_s21 }
 0xdab   :  { %v639_v24 = vpop.permute.xlu1 %638 }
 0xdac   :  { %v641_v26 = vmul.f32 %v1350_v13, %v639_v24 }
 0xdae   :  { %v645_v27 = vsel %vm644_vm7, %v641_v26, %v566_v61 }
 0xdaf   :  { %v649_v28 = vpack.c.bf16 %v645_v27, %v645_v27 }
 0xdb1   :  { %651 = vrot.lane.b32.xlu0 %v649_v28, %s1504_s4 }
 0xe23   :  { %v652_v29 = vpop.permute.xlu0 %651 }
 0xe24   :  { %1235 = vmatmul.mubr.msk.bf16.vlgmr.msra.gmra.mrb[4].mxu1 %vm93_vm0, %v652_v29  ;;  %v1303_v29 = vld [vmem:[#allocation10] sm:$0xff]  }
 0xe25   :  { %1247 = vmatpush3.bf16.msra.mxu1 %v1642_v4  ;;  %1250 = vmatprep.mubr.msk.bf16.mxu1 %vm1502_vm1, %v1501_v0 }
 0xe26   :  { %1248 = vmatprep.subr.bf16.mxu1 %v1501_v0 }
 0xe29   :  { %1249 = vmatpush3.bf16.msra.mxu1 %v1653_v6 }
 0xe2a   :  { %1262 = vmatprep.subr.bf16.mxu1 %v1501_v0 }
 0xef7   :  { %v690_v30 = vpop.f32.mrb[4].mxu1 }
 0xef8   :  { %v696_v31 = vadd.f32 %v690_v30, %v1683_v25  ;;  %v1236_v32 = vpop.f32.mrb[5].mxu1  ;;  %v646_v25 = vsel %vm644_vm7, %v635_v20, %v567_v21  ;;  %v1304_v30 = vld [vmem:[#allocation10 + $0x8] sm:$0xff]  }
 0xef9   :  { %v693_v12 = vpop.f32.mrb[6].mxu1  ;;  %v1305_v32 = vld [vmem:[#allocation11] sm:$0xff]  }
 0xefa   :  { %1353 = vtanh.f32 %v696_v31  ;;  %v1237_v33 = vpop.f32.mrb[7].mxu1  ;;  %v1121_v4 = vmul.f32 -1.442695, %v696_v31  ;;  %v1306_v12 = vld [vmem:[#allocation11 + $0x8] sm:$0xff]  }
 0xefc   :  { %1355 = vpow2.f32 %v1121_v4 }
 0xf04   :  { %v1354_v34 = vpop.eup %1353 }
 0xf05   :  { %706 = vrot.lane.b32.xlu1 %v1354_v34, %s1497_s21 }
 0xf06   :  { %v1356_v35 = vpop.eup %1355 }
 0xf07   :  { %v700_v36 = vadd.f32 1.0, %v1356_v35  ;;  %v1307_v35 = vld [vmem:[#allocation11 + $0x10] sm:$0xff]  }
 0xf09   :  { %1357 = vrcp.f32 %v700_v36 }
 0xf13   :  { %v1358_v37 = vpop.eup %1357 }
 0xf14   :  { %v704_v39 = vmul.f32 %v1358_v37, %v646_v25 }
 0xf77   :  { %v707_v38 = vpop.permute.xlu1 %706 }
 0xf78   :  { %v709_v6 = vmul.f32 %v1358_v37, %v707_v38  ;;  %v1309_v38 = vld [vmem:[#allocation11 + $0x20] sm:$0xff]  }
 0xf7a   :  { %711 = vrot.lane.b32.xlu0 %v709_v6, %s1504_s4  ;;  %v1311_v6 = vld [vmem:[#allocation11 + $0x30] sm:$0xff]  }
 0xfec   :  { %v712_v40 = vpop.permute.xlu0 %711 }
 0xfed   :  { %v714_v41 = vadd.f32 %v712_v40, %v704_v39 }
 0xfef   :  { %1359 = vtanh.f32 %v714_v41 }
 0xff9   :  { %v1360_v42 = vpop.eup %1359 }
 0xffa   :  { %717 = vrot.lane.b32.xlu1 %v1360_v42, %s1497_s21  ;;  %v1126_v42 = vld [vmem:[%s1848_s6] ss:$0 sm:$0xff]  ;;  %s1465_s6 = scalar_lea.vmem %s1088_s1, 128 }
 0xffb   :  { %p1466_p4 = scmp.ne.s32.totalorder %s1088_s1, %s1465_s6  ;;  %p1471_p6 = scmp.lt.s32.totalorder %s1465_s6, %s1465_s6 }
 0xffd   :  { %p1472_p7 = por %p1471_p6, %p1470_p5 }
 0xfff   :  { %p1473_p8 = pnand %p1472_p7, %p1466_p4 }
0x106c   :  { %v718_v43 = vpop.permute.xlu1 %717 }
0x106d   :  { %v720_v44 = vmul.f32 %v1358_v37, %v718_v43  ;;  %v1308_v37 = vld [vmem:[#allocation11 + $0x18] sm:$0xff]  }
0x106f   :  { %v724_v45 = vsel %vm723_vm8, %v720_v44, %v645_v27 }
0x1070   :  { %v728_v46 = vpack.c.bf16 %v724_v45, %v724_v45 }
0x1072   :  { %730 = vrot.lane.b32.xlu0 %v728_v46, %s1504_s4 }
0x10e4   :  { %v731_v48 = vpop.permute.xlu0 %730 }
0x10e5   :  { %1243 = vmatmul.mubr.msk.bf16.vlgmr.msra.gmra.mrb[24].mxu0 %vm93_vm0, %v731_v48 }
0x10e6   :  { %1258 = vmatprep.mubr.msk.bf16.mxu0 %vm1502_vm1, %v1501_v0  ;;  %1255 = vmatpush3.bf16.msra.mxu0 %v1303_v29 }
0x10e7   :  { %1256 = vmatprep.subr.bf16.mxu0 %v1501_v0 }
0x10ea   :  { %1257 = vmatpush3.bf16.msra.mxu0 %v1304_v30 }
0x11b8   :  { %v769_v49 = vpop.f32.mrb[24].mxu0 }
0x11b9   :  { %v775_v50 = vadd.f32 %v769_v49, %v1677_v19  ;;  %v1244_v51 = vpop.f32.mrb[25].mxu0  ;;  %v725_v19 = vsel %vm723_vm8, %v714_v41, %v646_v25  ;;  %v1312_v41 = vld [vmem:[#allocation11 + $0x38] sm:$0xff]   ;;  %v1130_v49 = vld [vmem:[%s1850_s8] ss:$0 sm:$0xff] }
0x11ba   :  { %v772_v52 = vpop.f32.mrb[26].mxu0 }
0x11bb   :  { %1361 = vtanh.f32 %v775_v50  ;;  %v1245_v53 = vpop.f32.mrb[27].mxu0  ;;  %v1123_v15 = vmul.f32 -1.442695, %v775_v50 }
0x11bd   :  { %1363 = vpow2.f32 %v1123_v15 }
0x11c5   :  { %v1362_v54 = vpop.eup %1361 }
0x11c6   :  { %785 = vrot.lane.b32.xlu1 %v1362_v54, %s1497_s21 }
0x11c7   :  { %v1364_v55 = vpop.eup %1363 }
0x11c8   :  { %v779_v56 = vadd.f32 1.0, %v1364_v55 }
0x11ca   :  { %1365 = vrcp.f32 %v779_v56 }
0x11d4   :  { %v1366_v57 = vpop.eup %1365 }
0x11d5   :  { %v783_v60 = vmul.f32 %v1366_v57, %v725_v19 }
0x1238   :  { %v786_v58 = vpop.permute.xlu1 %785 }
0x1239   :  { %v788_v59 = vmul.f32 %v1366_v57, %v786_v58 }
0x123b   :  { %790 = vrot.lane.b32.xlu0 %v788_v59, %s1504_s4 }
0x12ad   :  { %v791_v61 = vpop.permute.xlu0 %790 }
0x12ae   :  { %v793_v62 = vadd.f32 %v791_v61, %v783_v60 }
0x12b0   :  { %1367 = vtanh.f32 %v793_v62 }
0x12ba   :  { %v1368_v63 = vpop.eup %1367 }
0x12bb   :  { %796 = vrot.lane.b32.xlu1 %v1368_v63, %s1497_s21 }
0x132d   :  { %v797_v1 = vpop.permute.xlu1 %796 }
0x132e   :  { %v799_v2 = vmul.f32 %v1366_v57, %v797_v1 }
0x1330   :  { %v803_v3 = vsel %vm802_vm9, %v799_v2, %v724_v45 }
0x1331   :  { %v807_v5 = vpack.c.bf16 %v803_v3, %v803_v3 }
0x1333   :  { %809 = vrot.lane.b32.xlu0 %v807_v5, %s1504_s4 }
0x13a5   :  { %v810_v7 = vpop.permute.xlu0 %809 }
0x13a6   :  { %1251 = vmatmul.mubr.msk.bf16.vlgmr.msra.gmra.mrb[8].mxu1 %vm93_vm0, %v810_v7 }
0x13a7   :  { %1278 = vmatprep.mubr.msk.bf16.mxu1 %vm1502_vm1, %v1501_v0  ;;  %1263 = vmatpush3.bf16.msra.mxu1 %v1305_v32 }
0x13a8   :  { %1264 = vmatprep.subr.bf16.mxu1 %v1501_v0 }
0x13ab   :  { %1265 = vmatpush3.bf16.msra.mxu1 %v1306_v12 }
0x13ac   :  { %1266 = vmatprep.subr.bf16.mxu1 %v1501_v0 }
0x13af   :  { %1267 = vmatpush3.bf16.msra.mxu1 %v1307_v35 }
0x13b0   :  { %1268 = vmatprep.subr.bf16.mxu1 %v1501_v0 }
0x13b3   :  { %1269 = vmatpush3.bf16.msra.mxu1 %v1308_v37 }
0x13b4   :  { %1270 = vmatprep.subr.bf16.mxu1 %v1501_v0 }
0x13b7   :  { %1271 = vmatpush3.bf16.msra.mxu1 %v1309_v38 }
0x13b8   :  { %1272 = vmatprep.subr.bf16.mxu1 %v1501_v0 }
0x13bb   :  { %1273 = vmatpush3.bf16.msra.mxu1 %v1310_v47 }
0x13bc   :  { %1274 = vmatprep.subr.bf16.mxu1 %v1501_v0 }
0x13bf   :  { %1275 = vmatpush3.bf16.msra.mxu1 %v1311_v6 }
0x13c0   :  { %1276 = vmatprep.subr.bf16.mxu1 %v1501_v0 }
0x13c3   :  { %1277 = vmatpush3.bf16.msra.mxu1 %v1312_v41 }
0x1479   :  { %v848_v8 = vpop.f32.mrb[8].mxu1 }
0x147a   :  { %v854_v9 = vadd.f32 %v848_v8, %v1681_v23  ;;  %v1252_v10 = vpop.f32.mrb[9].mxu1  ;;  %v804_v23 = vsel %vm802_vm9, %v793_v62, %v725_v19 }
0x147b   :  { %v851_v11 = vpop.f32.mrb[10].mxu1 }
0x147c   :  { %1369 = vtanh.f32 %v854_v9  ;;  %v1253_v13 = vpop.f32.mrb[11].mxu1  ;;  %v1125_v16 = vmul.f32 -1.442695, %v854_v9 }
0x147e   :  { %1371 = vpow2.f32 %v1125_v16 }
0x1486   :  { %v1370_v14 = vpop.eup %1369 }
0x1487   :  { %864 = vrot.lane.b32.xlu1 %v1370_v14, %s1497_s21 }
0x1488   :  { %v1372_v21 = vpop.eup %1371 }
0x1489   :  { %v858_v17 = vadd.f32 1.0, %v1372_v21 }
0x148b   :  { %1373 = vrcp.f32 %v858_v17 }
0x1495   :  { %v1374_v18 = vpop.eup %1373 }
0x1496   :  { %v862_v24 = vmul.f32 %v1374_v18, %v804_v23 }
0x14f9   :  { %v865_v20 = vpop.permute.xlu1 %864 }
0x14fa   :  { %v867_v22 = vmul.f32 %v1374_v18, %v865_v20 }
0x14fc   :  { %869 = vrot.lane.b32.xlu0 %v867_v22, %s1504_s4 }
0x156e   :  { %v870_v26 = vpop.permute.xlu0 %869 }
0x156f   :  { %v872_v27 = vadd.f32 %v870_v26, %v862_v24 }
0x1571   :  { %1375 = vtanh.f32 %v872_v27  ;;  %v883_v28 = vsel %vm881_vm10, %v872_v27, %v804_v23 }
0x157b   :  { %v1376_v31 = vpop.eup %1375 }
0x157c   :  { %875 = vrot.lane.b32.xlu1 %v1376_v31, %s1497_s21 }
0x15ee   :  { %v876_v33 = vpop.permute.xlu1 %875 }
0x15ef   :  { %v878_v34 = vmul.f32 %v1374_v18, %v876_v33 }
0x15f1   :  { %v882_v4 = vsel %vm881_vm10, %v878_v34, %v803_v3 }
0x15f2   :  { %885 = vrot.lane.b32.xlu1 %v882_v4, %s1504_s4  ;;  %v897_v36 = vpack.c.bf16 %v882_v4, %v882_v4 }
0x15f4   :  { %910 = vrot.lane.b32.xlu0 %v897_v36, %s1504_s4 }
0x15f8   :  { %890 = vrot.lane.b32.xlu0 %v883_v28, %s1505_s23 }
0x1664   :  { %v886_v25 = vpop.permute.xlu1 %885 }
0x1665   :  { %888 = vst.msk [vmem:[#allocation3] sm:$0xff] %vm93_vm0, %v886_v25 }
0x1666   :  { %v911_v39 = vpop.permute.xlu0 %910 }
0x1667   :  { %1259 = vmatmul.mubr.msk.bf16.vlgmr.msra.gmra.mrb[28].mxu0 %vm93_vm0, %v911_v39 }
0x166a   :  { %v891_v40 = vpop.permute.xlu0 %890 }
0x166b   :  { %893 = vst.msk [vmem:[#allocation4] sm:$0xff] %vm93_vm0, %v891_v40 }
0x173a   :  { %v961_v43 = vpop.f32.mrb[28].mxu0 }
0x173b   :  { %v962_v44 = vadd.f32 %v1126_v42, %v961_v43  ;;  %v1260_v45 = vpop.f32.mrb[29].mxu0 }
0x173c   :  { %v964_v46 = vpop.f32.mrb[30].mxu0 }
0x173d   :  { %v967_v0 = vpack.c.bf16 %v962_v44, %v962_v44  ;;  %v1261_v48 = vpop.f32.mrb[31].mxu0 }
0x173f   :  { %1279 = vmatmul.mubr.bf16.vlgmr.msra.gmra.mrb[12].mxu1 %v967_v0 }
0x1812   :  { %v1073_v50 = vpop.f32.mrb[12].mxu1 }
0x1813   :  { %v1074_v51 = vadd.f32 %v1130_v49, %v1073_v50  ;;  %v1280_v52 = vpop.f32.mrb[13].mxu1 }
0x1814   :  { %v1076_v53 = vpop.f32.mrb[14].mxu1 }
0x1815   :  { %v1079_v54 = vmax.f32 %v1074_v51, 0.0  ;;  %v1281_v15 = vpop.f32.mrb[15].mxu1 }
0x1817   :  { %1080 = vst [vmem:[#allocation13] sm:$0xff] %v1079_v54 }
0x1818   :  { %1476 = shalt.err (!%p1473_p8)
}
0x1819   :  { %s1477_s8 = scalar_lea.hbm %s1851_s9, 128 }
0x181a   :  { %p1478_p9 = scmp.ne.s32.totalorder %s1851_s9, %s1477_s8  ;;  %p1481_p10 = scmp.lt.u32.totalorder %s1477_s8, %s1851_s9 }
0x181c   :  { %p1483_p11 = pnand %p1481_p10, %p1478_p9 }
0x181e   :  { %1486 = shalt.err (!%p1483_p11)
}
0x181f   :  { %1090 = dma.vmem_to_hbm [thread:$0]  %s1088_s1, 128, %s1851_s9, [#allocation7]  }
0x1820   :  { %1493 = dma.done.wait [#allocation7], 128  }
0x1821   :  { %1494 = vsyncadd [#allocation7], 4294967168 }
0x1822   :  { %1094 = vsyncpa [#allocation6], 1 }
0x1823   :  { %1095 = vsyncpa [#allocation9], 1 }
0x1824   :  { %1096 = vsyncpa [#allocation12], 1 }
0x1825   :  { %1097 = vsyncpa [#allocation7], 1 }

</bundles_post_ra>
